<compile_context>
chip_gen: v5e
topology: v5e:2x2
jax: 0.10.0
libtpu: 0.0.40
codegen_flags: <defaults>
</compile_context>

<pallas_src>
import jax
import jax.numpy as jnp
from jax.experimental import pallas as pl
from jax.experimental.pallas import tpu as pltpu


def _round_up(x, m):
    return ((x + m - 1) // m) * m


def _largest_aligned_divisor(dim, target, align):
    """Largest multiple of `align` that divides `dim` and is <= target, else None."""
    t = (min(target, dim) // align) * align
    while t >= align:
        if dim % t == 0:
            return t
        t -= align
    return None


def _lora_linear_kernel(x_ref, wt_ref, b_ref, xa_ref, wb_ref, o_ref, acc_ref):
    # x_ref:  (tm, tk)        input tile
    # wt_ref: (tk, tn)        transposed frozen linear weight tile
    # b_ref:  (1, tn)         bias tile (broadcast over rows)
    # xa_ref: (tm, rank_p)    precomputed x @ W_a tile (rank zero-padded)
    # wb_ref: (rank_p, tn)    LoRA B tile (alpha already folded in)
    # o_ref:  (tm, tn)        output tile
    # acc_ref:(tm, tn) f32    base-matmul accumulator (scratch)
    k = pl.program_id(2)

    @pl.when(k == 0)
    def _init():
        acc_ref[...] = jnp.zeros_like(acc_ref)

    # Native-dtype operands straight into the MXU; accumulate in f32.
    acc_ref[...] += jnp.dot(x_ref[...], wt_ref[...],
                            preferred_element_type=jnp.float32)

    @pl.when(k == pl.num_programs(2) - 1)
    def _finalize():
        lora = jnp.dot(xa_ref[...], wb_ref[...],
                       preferred_element_type=jnp.float32)
        out = acc_ref[...] + b_ref[...].astype(jnp.float32) + lora
        o_ref[...] = out.astype(o_ref.dtype)


def prepare_lora_params(w, b, w_a, w_b, alpha, *, weight_dtype=None, k_align=256):
    """One-time weight prep (done at parameter-load time, NOT per forward call).

    Returns (w_t, b2, w_a_p, w_b_p) where
      w_t:   (k_dim, out)   transposed frozen weight (K zero-padded to k_align)
      b2:    (1, out)       bias
      w_a_p: (k_dim, rank_p) LoRA A, rank zero-padded to a lane-dense width
      w_b_p: (rank_p, out)  LoRA B with alpha folded in
    Pass weight_dtype=jnp.bfloat16 in production for ~2x MXU/BW on the frozen path.
    """
    w, b = jnp.asarray(w), jnp.asarray(b)
    w_a, w_b = jnp.asarray(w_a), jnp.asarray(w_b)
    if weight_dtype is None:
        weight_dtype = w.dtype

    in_dim, rank = w_a.shape
    out_dim = w.shape[0]

    w_t = w.T.astype(weight_dtype)                      # (in, out), transposed once
    b2 = b.reshape(1, out_dim).astype(weight_dtype)     # (1, out)

    rank_p = _round_up(rank, 128)                       # lane-dense LoRA intermediate
    w_a_p = jnp.pad(w_a, ((0, 0), (0, rank_p - rank))).astype(weight_dtype)
    w_b_p = jnp.pad(w_b * jnp.asarray(alpha, w_b.dtype),
                    ((0, rank_p - rank), (0, 0))).astype(weight_dtype)

    # Pad the contraction (K) dim once at prep time so a 256-aligned tk always
    # divides it; zero K-rows contribute nothing to either matmul.
    if in_dim > k_align and in_dim % k_align != 0:
        k_pad = _round_up(in_dim, k_align) - in_dim
        w_t = jnp.pad(w_t, ((0, k_pad), (0, 0)))
        w_a_p = jnp.pad(w_a_p, ((0, k_pad), (0, 0)))
    return w_t, b2, w_a_p, w_b_p


def linear_with_lora(x, w_t, b2, w_a_p, w_b_p, *, tm=512, tn=512, tk=1024):
    """x: (..., in). w_t: (k_dim, out). b2: (1, out). w_a_p: (k_dim, rank_p).
    w_b_p: (rank_p, out). Weights must come from prepare_lora_params."""
    *lead, in_dim = x.shape
    k_dim, out_dim = w_t.shape
    rank_p = w_a_p.shape[1]
    assert w_a_p.shape[0] == k_dim and w_b_p.shape == (rank_p, out_dim)
    assert in_dim <= k_dim

    x2 = x.reshape(-1, in_dim)
    M = x2.shape[0]

    # Per-call K padding only needed for odd in_dim (weights were padded at prep).
    if in_dim != k_dim:
        x2 = jnp.pad(x2, ((0, 0), (0, k_dim - in_dim)))

    # LoRA-A projection hoisted out of the grid: computed exactly once per call.
    xa = jnp.dot(x2, w_a_p, preferred_element_type=jnp.float32).astype(w_b_p.dtype)

    # --- tile selection -------------------------------------------------------
    # M: small-M (decode) -> single full-extent row block so W streams once;
    #    large-M -> tm rows, ragged last block handled by the grid (no x copy).
    if M <= tm:
        tm = M
    grid_m = pl.cdiv(M, tm)

    # N: full-extent block for small out_dim; otherwise a 256-/128-aligned tile.
    #    A ragged last block is safe (out-of-range columns are clipped on write).
    if out_dim <= tn:
        tn = out_dim
    else:
        tn = (_largest_aligned_divisor(out_dim, tn, 256)
              or _largest_aligned_divisor(out_dim, tn, 128)
              or max(256, (tn // 256) * 256))
    grid_n = pl.cdiv(out_dim, tn)

    # K: reduction axis, must divide exactly; prep-time padding guarantees a
    #    256-aligned divisor exists for large in_dim.
    if k_dim <= tk:
        tk = k_dim
    else:
        tk = (_largest_aligned_divisor(k_dim, tk, 256)
              or _largest_aligned_divisor(k_dim, tk, 128)
              or k_dim)
    grid_k = k_dim // tk

    grid = (grid_m, grid_n, grid_k)

    # Rough VMEM budget: double-buffered inputs/output + f32 accumulator.
    isz = lambda dt: jnp.dtype(dt).itemsize
    vmem_est = (2 * tm * tk * isz(x2.dtype) + 2 * tk * tn * isz(w_t.dtype)
                + 2 * tn * isz(b2.dtype) + 2 * tm * rank_p * isz(xa.dtype)
                + 2 * rank_p * tn * isz(w_b_p.dtype)
                + 2 * tm * tn * isz(x.dtype) + tm * tn * 4)
    vmem_limit = None
    if vmem_est > 28 * 1024 * 1024:          # raise the 32 MiB scoped default
        vmem_limit = min(int(vmem_est * 5 // 4), 96 * 1024 * 1024)

    flops = 2 * M * k_dim * out_dim + 2 * M * rank_p * out_dim
    bytes_accessed = (x2.size * isz(x2.dtype) + w_t.size * isz(w_t.dtype)
                      + xa.size * isz(xa.dtype) + w_b_p.size * isz(w_b_p.dtype)
                      + b2.size * isz(b2.dtype) + M * out_dim * isz(x.dtype))

    out2 = pl.pallas_call(
        _lora_linear_kernel,
        out_shape=jax.ShapeDtypeStruct((M, out_dim), x.dtype),
        grid_spec=pltpu.PrefetchScalarGridSpec(
            num_scalar_prefetch=0,
            grid=grid,
            in_specs=[
                pl.BlockSpec((tm, tk), lambda i, j, k: (i, k)),        # x tile
                pl.BlockSpec((tk, tn), lambda i, j, k: (k, j)),        # W.T tile
                pl.BlockSpec((1, tn), lambda i, j, k: (0, j)),         # bias tile
                pl.BlockSpec((tm, rank_p), lambda i, j, k: (i, 0)),    # x@W_a tile
                pl.BlockSpec((rank_p, tn), lambda i, j, k: (0, j)),    # W_b tile
            ],
            out_specs=pl.BlockSpec((tm, tn), lambda i, j, k: (i, j)),
            scratch_shapes=[
                pltpu.VMEM((tm, tn), jnp.float32),   # base-matmul accumulator
            ],
        ),
        compiler_params=pltpu.CompilerParams(
            dimension_semantics=("parallel", "parallel", "arbitrary"),
            vmem_limit_bytes=vmem_limit),
        cost_estimate=pl.CostEstimate(flops=flops, transcendentals=0,
                                      bytes_accessed=bytes_accessed),
    )(x2, w_t, b2, xa, w_b_p)

    return out2.reshape(*lead, out_dim)


if __name__ == "__main__":
    key = jax.random.PRNGKey(0)
    k_x, k_w, k_b, k_a = jax.random.split(key, 4)

    batch, seq = 2, 8
    in_features, out_features = 32, 64
    rank, alpha = 4, 8.0

    x = jax.random.normal(k_x, (batch, seq, in_features), dtype=jnp.float32)

    # nn.Linear parameters (deterministic synthetic init)
    w = jax.random.normal(k_w, (out_features, in_features), dtype=jnp.float32) * 0.05
    b = jax.random.normal(k_b, (out_features,), dtype=jnp.float32) * 0.05

    # LoRALayer parameters: W_a ~ N(0,1)/sqrt(rank), W_b = zeros (as in __init__).
    std_dev = 1.0 / jnp.sqrt(jnp.float32(rank))
    w_a = jax.random.normal(k_a, (in_features, rank), dtype=jnp.float32) * std_dev
    w_b = jnp.zeros((rank, out_features), dtype=jnp.float32)
    # Perturb W_b slightly so the LoRA path actually contributes in the check
    # (zeros would make the LoRA branch a no-op as at torch init time).
    w_b = w_b + 0.01 * jax.random.normal(jax.random.PRNGKey(1),
                                         (rank, out_features), dtype=jnp.float32)

    # One-time parameter prep (transpose, alpha fold, rank/K padding).
    # Production: pass weight_dtype=jnp.bfloat16 here for ~2x MXU/BW.
    w_t, b2, w_a_p, w_b_p = prepare_lora_params(w, b, w_a, w_b, alpha)

    out = linear_with_lora(x, w_t, b2, w_a_p, w_b_p)
    jax.block_until_ready(out)

    # Pure-JAX reference check against the original (un-prepped) parameters.
    ref = x @ w.T + b + alpha * ((x @ w_a) @ w_b)
    assert out.shape == (batch, seq, out_features)
    assert jnp.allclose(out, ref, atol=1e-4, rtol=1e-4), "mismatch vs reference"

    print("KERNEL_OK")
</pallas_src>

<mosaic_0001>
module attributes {stable_mosaic.version = 11 : i64} {
  func.func @_lora_linear_kernel(%arg0: i32, %arg1: i32, %arg2: i32, %arg3: memref<16x32xf32, #tpu.memory_space<vmem>>, %arg4: memref<32x64xf32, #tpu.memory_space<vmem>>, %arg5: memref<1x64xf32, #tpu.memory_space<vmem>>, %arg6: memref<16x128xf32, #tpu.memory_space<vmem>>, %arg7: memref<128x64xf32, #tpu.memory_space<vmem>>, %arg8: memref<16x64xf32, #tpu.memory_space<vmem>>, %arg9: memref<16x64xf32, #tpu.memory_space<vmem>>) attributes {dimension_semantics = [#tpu.dimension_semantics<parallel>, #tpu.dimension_semantics<parallel>, #tpu.dimension_semantics<arbitrary>], iteration_bounds = array<i64: 1, 1, 1>, scalar_prefetch = 0 : i64, scratch_operands = 1 : i64, tpu.core_type = #tpu.core_type<tc>, window_params = [{transform_indices = @transform_0, window_bounds = array<i64: 16, 32>}, {transform_indices = @transform_1, window_bounds = array<i64: 32, 64>}, {transform_indices = @transform_2, window_bounds = array<i64: 1, 64>}, {transform_indices = @transform_3, window_bounds = array<i64: 16, 128>}, {transform_indices = @transform_4, window_bounds = array<i64: 128, 64>}, {transform_indices = @transform_5, window_bounds = array<i64: 16, 64>}]} {
    %c0_i32 = arith.constant 0 : i32
    %0 = arith.cmpi eq, %arg2, %c0_i32 : i32
    %1 = arith.extui %0 : i1 to i32
    %c0_i32_0 = arith.constant 0 : i32
    %2 = arith.cmpi ne, %1, %c0_i32_0 : i32
    scf.if %2 {
      %cst_10 = arith.constant 0.000000e+00 : f32
      %12 = vector.broadcast %cst_10 : f32 to vector<16x64xf32>
      %c0_11 = arith.constant 0 : index
      %c0_12 = arith.constant 0 : index
      %13 = vector.load %arg9[%c0_11, %c0_12] : memref<16x64xf32, #tpu.memory_space<vmem>>, vector<16x64xf32>
      tpu.vector_store %arg9[%c0_11, %c0_12], %12 {strides = array<i32>} : memref<16x64xf32, #tpu.memory_space<vmem>>, vector<16x64xf32>,
    } else {
    }
    %c0 = arith.constant 0 : index
    %c0_1 = arith.constant 0 : index
    %3 = vector.load %arg9[%c0, %c0_1] : memref<16x64xf32, #tpu.memory_space<vmem>>, vector<16x64xf32>
    %c0_2 = arith.constant 0 : index
    %c0_3 = arith.constant 0 : index
    %4 = vector.load %arg3[%c0_2, %c0_3] : memref<16x32xf32, #tpu.memory_space<vmem>>, vector<16x32xf32>
    %c0_4 = arith.constant 0 : index
    %c0_5 = arith.constant 0 : index
    %5 = vector.load %arg4[%c0_4, %c0_5] : memref<32x64xf32, #tpu.memory_space<vmem>>, vector<32x64xf32>
    %cst = arith.constant dense<0.000000e+00> : vector<16x64xf32>
    %6 = tpu.matmul %4, %5, %cst {dimension_numbers = #tpu.dot_dimension_numbers<[1], [0], [0], [1], [0, 0, 1, 1], [], []>} : vector<16x32xf32>, vector<32x64xf32>, vector<16x64xf32> -> vector<16x64xf32>
    %7 = arith.addf %3, %6 : vector<16x64xf32>
    %c0_6 = arith.constant 0 : index
    %c0_7 = arith.constant 0 : index
    %8 = vector.load %arg9[%c0_6, %c0_7] : memref<16x64xf32, #tpu.memory_space<vmem>>, vector<16x64xf32>
    tpu.vector_store %arg9[%c0_6, %c0_7], %7 {strides = array<i32>} : memref<16x64xf32, #tpu.memory_space<vmem>>, vector<16x64xf32>,
    %c0_i32_8 = arith.constant 0 : i32
    %9 = arith.cmpi eq, %arg2, %c0_i32_8 : i32
    %10 = arith.extui %9 : i1 to i32
    %c0_i32_9 = arith.constant 0 : i32
    %11 = arith.cmpi ne, %10, %c0_i32_9 : i32
    scf.if %11 {
      %c0_10 = arith.constant 0 : index
      %c0_11 = arith.constant 0 : index
      %12 = vector.load %arg6[%c0_10, %c0_11] : memref<16x128xf32, #tpu.memory_space<vmem>>, vector<16x128xf32>
      %c0_12 = arith.constant 0 : index
      %c0_13 = arith.constant 0 : index
      %13 = vector.load %arg7[%c0_12, %c0_13] : memref<128x64xf32, #tpu.memory_space<vmem>>, vector<128x64xf32>
      %cst_14 = arith.constant dense<0.000000e+00> : vector<16x64xf32>
      %14 = tpu.matmul %12, %13, %cst_14 {dimension_numbers = #tpu.dot_dimension_numbers<[1], [0], [0], [1], [0, 0, 1, 1], [], []>} : vector<16x128xf32>, vector<128x64xf32>, vector<16x64xf32> -> vector<16x64xf32>
      %c0_15 = arith.constant 0 : index
      %c0_16 = arith.constant 0 : index
      %15 = vector.load %arg9[%c0_15, %c0_16] : memref<16x64xf32, #tpu.memory_space<vmem>>, vector<16x64xf32>
      %c0_17 = arith.constant 0 : index
      %c0_18 = arith.constant 0 : index
      %16 = vector.load %arg5[%c0_17, %c0_18] : memref<1x64xf32, #tpu.memory_space<vmem>>, vector<1x64xf32>
      %17 = vector.broadcast %16 : vector<1x64xf32> to vector<16x64xf32>
      %18 = arith.addf %15, %17 : vector<16x64xf32>
      %19 = arith.addf %18, %14 : vector<16x64xf32>
      %c0_19 = arith.constant 0 : index
      %c0_20 = arith.constant 0 : index
      %20 = vector.load %arg8[%c0_19, %c0_20] : memref<16x64xf32, #tpu.memory_space<vmem>>, vector<16x64xf32>
      tpu.vector_store %arg8[%c0_19, %c0_20], %19 {strides = array<i32>} : memref<16x64xf32, #tpu.memory_space<vmem>>, vector<16x64xf32>,
    } else {
    }
    return
  }
  func.func @transform_0(%arg0: i32, %arg1: i32, %arg2: i32) -> (i32, i32) {
    %c0_i32 = arith.constant 0 : i32
    return %arg0, %arg2 : i32, i32
  }
  func.func @transform_1(%arg0: i32, %arg1: i32, %arg2: i32) -> (i32, i32) {
    %c0_i32 = arith.constant 0 : i32
    return %arg2, %arg1 : i32, i32
  }
  func.func @transform_2(%arg0: i32, %arg1: i32, %arg2: i32) -> (i32, i32) {
    %c0_i32 = arith.constant 0 : i32
    %c0_i32_0 = arith.constant 0 : i32
    return %c0_i32, %arg1 : i32, i32
  }
  func.func @transform_3(%arg0: i32, %arg1: i32, %arg2: i32) -> (i32, i32) {
    %c0_i32 = arith.constant 0 : i32
    %c0_i32_0 = arith.constant 0 : i32
    return %arg0, %c0_i32 : i32, i32
  }
  func.func @transform_4(%arg0: i32, %arg1: i32, %arg2: i32) -> (i32, i32) {
    %c0_i32 = arith.constant 0 : i32
    %c0_i32_0 = arith.constant 0 : i32
    return %c0_i32, %arg1 : i32, i32
  }
  func.func @transform_5(%arg0: i32, %arg1: i32, %arg2: i32) -> (i32, i32) {
    %c0_i32 = arith.constant 0 : i32
    return %arg0, %arg1 : i32, i32
  }
}

</mosaic_0001>

<bundles_post_ra>
// kernel: tpu_custom_call.1
= control target key start
LH: loop header
LB: loop body
LE: loop exit
PB: predicated region body
PF: predicated region fallthrough
CT: control target
= control target key end

     0   :  { %vm25_vm0 = vcmask 523264   ;;  %v194_v3 = vmov 0.0   ;;  %vm36_vm1 = vcmask 261120   ;;  %s314_s0 = inlined_call_operand.vmem [shape: f32[16,32], index: 0, kind: input, shape index: {}]   ;;  %s315_s1 = inlined_call_operand.vmem [shape: f32[32,64], index: 1, kind: input, shape index: {}]   ;;  %s316_s2 = inlined_call_operand.vmem [shape: f32[1,64], index: 2, kind: input, shape index: {}]   ;;  %s317_s3 = inlined_call_operand.vmem [shape: f32[16,128], index: 3, kind: input, shape index: {}]   ;;  %s318_s4 = inlined_call_operand.vmem [shape: f32[128,64], index: 4, kind: input, shape index: {}]   ;;  %s319_s5 = inlined_call_operand.hbm [shape: f32[16,64], index: 5, kind: output, shape index: {}]  }
   0x1   :  { %v91_v0 = vld [vmem:[%s318_s4 + $0x78] sm:$0xff]  ;;  %v90_v1 = vld [vmem:[%s318_s4 + $0x70] sm:$0xff]  ;;  %26 = vst.msk [vmem:[#allocation2] sm:$0xff] %vm25_vm0, %v194_v3  ;;  %v89_v4 = vld [vmem:[%s318_s4 + $0x68] sm:$0xff] }
   0x2   :  { %92 = vmatpush.msra.mxu1 %v91_v0  ;;  %147 = vmatpush.msra.mxu2 %v91_v0  ;;  %v35_v2 = vld [vmem:[%s315_s1 + $0x18] sm:$0xff]  ;;  %v34_v5 = vld [vmem:[%s315_s1 + $0x10] sm:$0xff]  ;;  %27 = vst.msk [vmem:[#allocation2 + $0x8] sm:$0xff] %vm25_vm0, %v194_v3  ;;  %v33_v6 = vld [vmem:[%s315_s1 + $0x8] sm:$0xff] }
   0x3   :  { %55 = vmatpush.msra.mxu0 %v35_v2  ;;  %v88_v7 = vld [vmem:[%s318_s4 + $0x60] sm:$0xff]  ;;  %v87_v9 = vld [vmem:[%s318_s4 + $0x58] sm:$0xff]  ;;  %v86_v11 = vld [vmem:[%s318_s4 + $0x50] sm:$0xff] }
   0x4   :  { %93 = vmatpush.msra.mxu1 %v90_v1  ;;  %148 = vmatpush.msra.mxu2 %v90_v1  ;;  %v32_v8 = vld [vmem:[%s315_s1] sm:$0xff] }
   0x5   :  { %56 = vmatpush.msra.mxu0 %v34_v5  ;;  %v30_v10 = vld [vmem:[%s314_s0] sm:$0xff] }
   0x6   :  { %94 = vmatpush.msra.mxu1 %v89_v4  ;;  %149 = vmatpush.msra.mxu2 %v89_v4 }
   0x7   :  { %57 = vmatpush.msra.mxu0 %v33_v6 }
   0x8   :  { %95 = vmatpush.msra.mxu1 %v88_v7  ;;  %150 = vmatpush.msra.mxu2 %v88_v7 }
   0x9   :  { %58 = vmatpush.msra.mxu0 %v32_v8 }
   0xa   :  { %10 = vsyncpa [#allocation4], 0  ;;  %96 = vmatpush.msra.mxu1 %v87_v9  ;;  %151 = vmatpush.msra.mxu2 %v87_v9  ;;  %v85_v12 = vld [vmem:[%s318_s4 + $0x48] sm:$0xff]  ;;  %v84_v13 = vld [vmem:[%s318_s4 + $0x40] sm:$0xff]  ;;  %s133_s17 = sshll.u32 %s319_s5, 4  ;;  %s197_s18 = smov 8   ;;  %s134_s17 = int_to_ptr.hbm [resolvable:$true] %s133_s17 }
   0xb   :  { %145 = vmatmul.msk.f32.vlgmr.msra.gmra.mxu0 %vm36_vm1, %v30_v10  ;;  %v83_v14 = vld [vmem:[%s318_s4 + $0x38] sm:$0xff]  ;;  %v31_v15 = vld [vmem:[%s314_s0 + $0x8] sm:$0xff]  ;;  %v82_v16 = vld [vmem:[%s318_s4 + $0x30] sm:$0xff] }
   0xc   :  { %97 = vmatpush.msra.mxu1 %v86_v11  ;;  %152 = vmatpush.msra.mxu2 %v86_v11  ;;  %v81_v17 = vld [vmem:[%s318_s4 + $0x28] sm:$0xff]  ;;  %v80_v18 = vld [vmem:[%s318_s4 + $0x20] sm:$0xff]  ;;  %v79_v19 = vld [vmem:[%s318_s4 + $0x18] sm:$0xff] }
   0xd   :  { %v78_v20 = vld [vmem:[%s318_s4 + $0x10] sm:$0xff]  ;;  %v77_v21 = vld [vmem:[%s318_s4 + $0x8] sm:$0xff]  ;;  %v76_v22 = vld [vmem:[%s318_s4] sm:$0xff] }
   0xe   :  { %98 = vmatpush.msra.mxu1 %v85_v12  ;;  %153 = vmatpush.msra.mxu2 %v85_v12  ;;  %v74_v23 = vld [vmem:[%s317_s3] sm:$0xff]  ;;  %v75_v24 = vld [vmem:[%s317_s3 + $0x8] sm:$0xff]  ;;  %s195_s3 = smov [#allocation3]  }
   0xf   :  { %v28_v25 = vld [vmem:[#allocation2] sm:$0xff]  ;;  %v29_v28 = vld [vmem:[#allocation2 + $0x8] sm:$0xff]  ;;  %s131_s1 = sshll.u32 %s195_s3, 4  ;;  %s132_s1 = int_to_ptr.vmem [resolvable:$true] %s131_s1 }
  0x10   :  { %99 = vmatpush.msra.mxu1 %v84_v13  ;;  %154 = vmatpush.msra.mxu2 %v84_v13  ;;  %v167_v31 = vld [vmem:[%s316_s2] ss:$0 sm:$0xff]  ;;  %s196_s2 = smov 128  }
  0x12   :  { %100 = vmatpush.msra.mxu1 %v83_v14  ;;  %155 = vmatpush.msra.mxu2 %v83_v14 }
  0x13   :  { %146 = vmatmul.msk.f32.gmra.mxu0 %vm36_vm1, %v31_v15 }
  0x14   :  { %101 = vmatpush.msra.mxu1 %v82_v16  ;;  %156 = vmatpush.msra.mxu2 %v82_v16 }
  0x16   :  { %102 = vmatpush.msra.mxu1 %v81_v17  ;;  %157 = vmatpush.msra.mxu2 %v81_v17 }
  0x18   :  { %103 = vmatpush.msra.mxu1 %v80_v18  ;;  %158 = vmatpush.msra.mxu2 %v80_v18 }
  0x1a   :  { %104 = vmatpush.msra.mxu1 %v79_v19  ;;  %159 = vmatpush.msra.mxu2 %v79_v19 }
  0x1c   :  { %105 = vmatpush.msra.mxu1 %v78_v20  ;;  %160 = vmatpush.msra.mxu2 %v78_v20 }
  0x1e   :  { %106 = vmatpush.msra.mxu1 %v77_v21  ;;  %161 = vmatpush.msra.mxu2 %v77_v21 }
  0x20   :  { %107 = vmatpush.msra.mxu1 %v76_v22  ;;  %162 = vmatpush.msra.mxu2 %v76_v22 }
  0x21   :  { %108 = vmatmul.f32.vlgmr.msra.gmra.mxu1 %v74_v23  ;;  %111 = vmatmul.f32.vlgmr.msra.gmra.mxu2 %v75_v24 }
  0x88   :  { %v60_v26 = vpop.f32.mrf.mxu0 }
  0x89   :  { %v66_v27 = vadd.f32 %v60_v26, %v28_v25 }
  0x8b   :  { %69 = vst.msk [vmem:[#allocation2] sm:$0xff] %vm25_vm0, %v66_v27 }
  0x90   :  { %v63_v29 = vpop.f32.mrf.mxu0 }
  0x91   :  { %v67_v30 = vadd.f32 %v63_v29, %v29_v28 }
  0x92   :  { %v115_v32 = vld [vmem:[#allocation2] sm:$0xff] }
  0x93   :  { %70 = vst.msk [vmem:[#allocation2 + $0x8] sm:$0xff] %vm25_vm0, %v67_v30  ;;  %v121_v33 = vadd.f32 %v167_v31, %v115_v32 }
  0x9a   :  { %v116_v35 = vld [vmem:[#allocation2 + $0x8] sm:$0xff] }
  0x9b   :  { %v122_v37 = vadd.f32 %v167_v31, %v116_v35 }
  0x9e   :  { %v109_v34 = vpop.f32.mrf.mxu1 }
  0x9f   :  { %v123_v36 = vadd.f32 %v121_v33, %v109_v34 }
  0xa1   :  { %125 = vst.msk [vmem:[#allocation3] sm:$0xff] %vm25_vm0, %v123_v36 }
  0xa4   :  { %v112_v38 = vpop.f32.mrf.mxu2 }
  0xa5   :  { %v124_v39 = vadd.f32 %v122_v37, %v112_v38 }
  0xa7   :  { %126 = vst.msk [vmem:[#allocation3 + $0x8] sm:$0xff] %vm25_vm0, %v124_v39 }
  0xa8   :  { %139 = dma.vmem_to_hbm [thread:$0]  %s132_s1, 256, %s134_s17, [#allocation4], %s196_s2, %s196_s2, %s197_s18  }
  0xa9   :  { %192 = dma.done.wait [#allocation4], 256  }
  0xaa   :  { %193 = vsyncadd [#allocation4], 4294967040 }
  0xab   :  { %144 = vsyncpa [#allocation4], 1 }

</bundles_post_ra>
